<compile_context>
chip_gen: v5e
topology: v5e:2x2
jax: 0.10.0
libtpu: 0.0.40
codegen_flags: <defaults>
</compile_context>

<pallas_src>
import functools

import jax
import jax.numpy as jnp
from jax import lax
from jax.experimental import pallas as pl
from jax.experimental.pallas import tpu as pltpu


def _diff_kernel(x_ref, w_ref, b_ref, o_ref, *, e_lambda, H, W, use_mxu):
    Bt, C, HW = x_ref.shape
    inv_n = 1.0 / float(HW - 1)

    # Boundary masks for the separable 3x3 box filter on the flattened H*W
    # axis.  Hoisted: built once per grid step (JAX does not CSE broadcasts).
    idx = lax.broadcasted_iota(jnp.int32, (1, HW), 1)
    col = idx % W
    m_l = jnp.broadcast_to(jnp.where(col > 0, 1.0, 0.0), (C, HW))           # left neighbour valid
    m_r = jnp.broadcast_to(jnp.where(col < W - 1, 1.0, 0.0), (C, HW))       # right neighbour valid
    m_u = jnp.broadcast_to(jnp.where(idx >= W, 1.0, 0.0), (C, HW))          # row above valid
    m_d = jnp.broadcast_to(jnp.where(idx < (H - 1) * W, 1.0, 0.0), (C, HW)) # row below valid

    def simam(v):                                  # v: (C, HW) f32
        mu = jnp.mean(v, axis=-1, keepdims=True)
        d = (v - mu) * (v - mu)
        s = jnp.sum(d, axis=-1, keepdims=True)
        # exact reciprocal computed on the tiny (C, 1) tensor, then a cheap
        # full-slab broadcast multiply (avoids a full-slab divide).
        inv_den = 1.0 / (4.0 * (s * inv_n + e_lambda))
        y = d * inv_den + 0.5
        # TODO(synk): if the bundle dump shows EUP as the binding slot, the
        # three full-slab sigmoids could share exp / use a rational approx.
        return v * jax.nn.sigmoid(y)

    def box3_sum(v):
        # Separable 3x3 sum with zero padding (count_include_pad): horizontal
        # rolls (+/-1 on the lane axis) then vertical rolls (+/-W), boundary
        # wrap-around killed by the precomputed masks.  Rolls run on the XLU.
        h = v + m_l * pltpu.roll(v, 1, axis=1) + m_r * pltpu.roll(v, HW - 1, axis=1)
        return h + m_u * pltpu.roll(h, W, axis=1) + m_d * pltpu.roll(h, HW - W, axis=1)

    bias = b_ref[...].astype(jnp.float32)          # (C, 1) folded conv-bias + BN
    if use_mxu:
        w = w_ref[...].astype(jnp.float32)         # (C_out, C_in) folded weight

    # Static unroll over the batch tile: amortizes per-grid-step overhead while
    # keeping every op rank-2 (C, HW) -> no in-kernel relayouts.
    for b in range(Bt):
        x = x_ref[b].astype(jnp.float32)           # (C, HW)  f32 math (safe on v5e too)
        x1 = simam(x)

        edge = x1 - box3_sum(x1) * (1.0 / 9.0)

        if use_mxu:
            # Larger C: feed the MXU directly.
            z = jnp.dot(w, edge, preferred_element_type=jnp.float32) + bias
        else:
            # Tiny C: the (C,C)@(C,HW) matmul would use <4% of the MXU; do the
            # 1x1 conv as C broadcast-FMA passes on the VPU instead.
            # w_ref[c] is the (C_out, 1) column of the folded weight.
            z = w_ref[0] * edge[0:1, :]
            for c in range(1, C):
                z = z + w_ref[c] * edge[c:c + 1, :]
            z = z + bias

        wgt = jax.nn.sigmoid(z)
        out = simam(wgt * x1 + x1)
        o_ref[b] = out.astype(o_ref.dtype)


def _pick_batch_tile(B, C, HW):
    """Largest batch tile that fits a conservative VMEM budget (sized for
    v7x's 64 MiB physical VMEM) while keeping >= 2 grid steps when B >= 2 so
    dimension_semantics=("parallel",) can use both v7x TensorCores."""
    per_image = C * HW * 4 * 12            # ~live f32 intermediates + IO double-buffers
    budget = 24 * 1024 * 1024
    max_bt = max(1, min(8, budget // per_image))   # also bound the static unroll
    cap = B if B < 2 else B // 2
    best = 1
    for d in range(1, B + 1):
        if B % d == 0 and d <= max_bt and d <= cap:
            best = d
    return best


def diff_module_forward(x, conv_w, conv_b, bn_gamma, bn_beta, bn_mean, bn_var,
                        *, bn_eps=1e-5, e_lambda=1e-4):
    B, C, H, W = x.shape
    HW = H * W

    # TODO(synk): training-mode BatchNorm (batch statistics) not implemented;
    # eval-mode BN is folded, together with the conv bias, into the weights:
    #   bn(conv(e)) = (scale*W) @ e + (scale*b_conv + shift)
    inv_std = 1.0 / jnp.sqrt(bn_var.astype(jnp.float32) + bn_eps)
    scale = bn_gamma.astype(jnp.float32) * inv_std                       # (C,)
    shift = bn_beta.astype(jnp.float32) - bn_mean.astype(jnp.float32) * scale
    w = conv_w.reshape(C, C).astype(jnp.float32) * scale[:, None]        # (C_out, C_in)
    bias = (scale * conv_b.astype(jnp.float32) + shift).reshape(C, 1)    # (C_out, 1)

    use_mxu = C > 8
    if use_mxu:
        w_arg = w                                                        # (C_out, C_in)
        w_spec = pl.BlockSpec((C, C), lambda b: (0, 0))
    else:
        # Broadcast-friendly layout for the VPU path: w_arg[c_in] = (C_out, 1)
        w_arg = w.T.reshape(C, C, 1)
        w_spec = pl.BlockSpec((C, C, 1), lambda b: (0, 0, 0))

    x2 = x.reshape(B, C, HW)            # free reshape -> lane-dense last dim

    Bt = _pick_batch_tile(B, C, HW)
    grid = (B // Bt,)

    kernel = functools.partial(_diff_kernel, e_lambda=float(e_lambda),
                               H=H, W=W, use_mxu=use_mxu)
    out2 = pl.pallas_call(
        kernel,
        out_shape=jax.ShapeDtypeStruct((B, C, HW), x.dtype),
        grid=grid,
        in_specs=[
            pl.BlockSpec((Bt, C, HW), lambda b: (b, 0, 0)),
            w_spec,
            pl.BlockSpec((C, 1), lambda b: (0, 0)),
        ],
        out_specs=pl.BlockSpec((Bt, C, HW), lambda b: (b, 0, 0)),
        compiler_params=pltpu.CompilerParams(
            dimension_semantics=("parallel",),
            # Raise above the 16/32 MiB scoped defaults; still <= v7x physical.
            vmem_limit_bytes=64 * 1024 * 1024,
        ),
    )(x2, w_arg, bias)
    return out2.reshape(B, C, H, W)


# ------------------------- pure-JAX reference -------------------------
def _simam_ref(x, e_lambda):
    n = x.shape[2] * x.shape[3] - 1
    d = (x - x.mean(axis=(2, 3), keepdims=True)) ** 2
    y = d / (4.0 * (d.sum(axis=(2, 3), keepdims=True) / n + e_lambda)) + 0.5
    return x * jax.nn.sigmoid(y)


def _ref_forward(x, conv_w, conv_b, bn_gamma, bn_beta, bn_mean, bn_var,
                 bn_eps=1e-5, e_lambda=1e-4):
    C = x.shape[1]
    x1 = _simam_ref(x, e_lambda)
    s = lax.reduce_window(x1, 0.0, lax.add, (1, 1, 3, 3), (1, 1, 1, 1),
                          [(0, 0), (0, 0), (1, 1), (1, 1)])
    edge = x1 - s / 9.0
    z = jnp.einsum('oc,bchw->bohw', conv_w.reshape(C, C), edge)
    z = z + conv_b.reshape(1, C, 1, 1)
    z = (z - bn_mean.reshape(1, C, 1, 1)) / jnp.sqrt(
        bn_var.reshape(1, C, 1, 1) + bn_eps)
    z = z * bn_gamma.reshape(1, C, 1, 1) + bn_beta.reshape(1, C, 1, 1)
    out = jax.nn.sigmoid(z) * x1 + x1
    return _simam_ref(out, e_lambda)


if __name__ == "__main__":
    B, C, H, W = 2, 4, 16, 16
    key = jax.random.PRNGKey(0)
    kx, kw, kb, kg, kbt, km, kv = jax.random.split(key, 7)

    x = jax.random.normal(kx, (B, C, H, W), jnp.float32)
    conv_w = 0.1 * jax.random.normal(kw, (C, C, 1, 1), jnp.float32)
    conv_b = 0.1 * jax.random.normal(kb, (C,), jnp.float32)
    bn_gamma = 1.0 + 0.1 * jax.random.normal(kg, (C,), jnp.float32)
    bn_beta = 0.1 * jax.random.normal(kbt, (C,), jnp.float32)
    bn_mean = 0.1 * jax.random.normal(km, (C,), jnp.float32)
    bn_var = jax.random.uniform(kv, (C,), jnp.float32, 0.5, 1.5)

    out = diff_module_forward(x, conv_w, conv_b, bn_gamma, bn_beta,
                              bn_mean, bn_var)
    out = jax.block_until_ready(out)

    ref = _ref_forward(x, conv_w, conv_b, bn_gamma, bn_beta, bn_mean, bn_var)
    assert out.shape == (B, C, H, W)
    assert jnp.allclose(out, ref, atol=1e-4, rtol=1e-4), \
        float(jnp.max(jnp.abs(out - ref)))
    print("KERNEL_OK")
</pallas_src>

<mosaic_0001>
module attributes {stable_mosaic.version = 11 : i64} {
  func.func @_diff_kernel(%arg0: i32, %arg1: memref<1x4x256xf32, #tpu.memory_space<vmem>>, %arg2: memref<4x4x1xf32, #tpu.memory_space<vmem>>, %arg3: memref<4x1xf32, #tpu.memory_space<vmem>>, %arg4: memref<1x4x256xf32, #tpu.memory_space<vmem>>) attributes {dimension_semantics = [#tpu.dimension_semantics<parallel>], iteration_bounds = array<i64: 2>, scalar_prefetch = 0 : i64, scratch_operands = 0 : i64, tpu.core_type = #tpu.core_type<tc>, window_params = [{transform_indices = @transform_0, window_bounds = array<i64: 1, 4, 256>}, {pipeline_mode = #tpu.pipeline_mode<synchronous>, transform_indices = @transform_1, window_bounds = array<i64: 4, 4, 1>}, {pipeline_mode = #tpu.pipeline_mode<synchronous>, transform_indices = @transform_2, window_bounds = array<i64: 4, 1>}, {transform_indices = @transform_3, window_bounds = array<i64: 1, 4, 256>}]} {
    %0 = tpu.iota {dimensions = array<i32: 1>} : vector<1x256xi32>
    %c16_i32 = arith.constant 16 : i32
    %c0_i32 = arith.constant 0 : i32
    %1 = arith.cmpi eq, %c16_i32, %c0_i32 : i32
    %c1_i32 = arith.constant 1 : i32
    %2 = arith.select %1, %c1_i32, %c16_i32 : i32
    %3 = vector.broadcast %2 : i32 to vector<1x256xi32>
    %4 = arith.remsi %0, %3 : vector<1x256xi32>
    %c0_i32_0 = arith.constant 0 : i32
    %5 = vector.broadcast %c0_i32_0 : i32 to vector<1x256xi32>
    %6 = arith.cmpi ne, %4, %5 : vector<1x256xi32>
    %c0_i32_1 = arith.constant 0 : i32
    %7 = vector.broadcast %c0_i32_1 : i32 to vector<1x256xi32>
    %8 = arith.cmpi slt, %4, %7 : vector<1x256xi32>
    %c0_i32_2 = arith.constant 0 : i32
    %9 = arith.cmpi slt, %2, %c0_i32_2 : i32
    %10 = vector.broadcast %9 : i1 to vector<1x256xi1>
    %11 = vector.broadcast %10 : vector<1x256xi1> to vector<1x256xi1>
    %12 = arith.xori %8, %11 : vector<1x256xi1>
    %13 = arith.andi %12, %6 : vector<1x256xi1>
    %14 = vector.broadcast %2 : i32 to vector<1x256xi32>
    %15 = arith.addi %4, %14 : vector<1x256xi32>
    %16 = arith.select %13, %15, %4 : vector<1x256xi1>, vector<1x256xi32>
    %c0_i32_3 = arith.constant 0 : i32
    %17 = vector.broadcast %c0_i32_3 : i32 to vector<1x256xi32>
    %18 = arith.cmpi sgt, %16, %17 : vector<1x256xi32>
    %cst = arith.constant 1.000000e+00 : f32
    %cst_4 = arith.constant 0.000000e+00 : f32
    %19 = vector.broadcast %cst : f32 to vector<1x256xf32>
    %20 = vector.broadcast %cst_4 : f32 to vector<1x256xf32>
    %21 = arith.select %18, %19, %20 : vector<1x256xi1>, vector<1x256xf32>
    %22 = vector.shape_cast %21 : vector<1x256xf32> to vector<1x256xf32>
    %23 = vector.broadcast %22 : vector<1x256xf32> to vector<4x256xf32>
    %c15_i32 = arith.constant 15 : i32
    %24 = vector.broadcast %c15_i32 : i32 to vector<1x256xi32>
    %25 = arith.cmpi slt, %16, %24 : vector<1x256xi32>
    %cst_5 = arith.constant 1.000000e+00 : f32
    %cst_6 = arith.constant 0.000000e+00 : f32
    %26 = vector.broadcast %cst_5 : f32 to vector<1x256xf32>
    %27 = vector.broadcast %cst_6 : f32 to vector<1x256xf32>
    %28 = arith.select %25, %26, %27 : vector<1x256xi1>, vector<1x256xf32>
    %29 = vector.shape_cast %28 : vector<1x256xf32> to vector<1x256xf32>
    %30 = vector.broadcast %29 : vector<1x256xf32> to vector<4x256xf32>
    %c16_i32_7 = arith.constant 16 : i32
    %31 = vector.broadcast %c16_i32_7 : i32 to vector<1x256xi32>
    %32 = arith.cmpi sge, %0, %31 : vector<1x256xi32>
    %cst_8 = arith.constant 1.000000e+00 : f32
    %cst_9 = arith.constant 0.000000e+00 : f32
    %33 = vector.broadcast %cst_8 : f32 to vector<1x256xf32>
    %34 = vector.broadcast %cst_9 : f32 to vector<1x256xf32>
    %35 = arith.select %32, %33, %34 : vector<1x256xi1>, vector<1x256xf32>
    %36 = vector.shape_cast %35 : vector<1x256xf32> to vector<1x256xf32>
    %37 = vector.broadcast %36 : vector<1x256xf32> to vector<4x256xf32>
    %c240_i32 = arith.constant 240 : i32
    %38 = vector.broadcast %c240_i32 : i32 to vector<1x256xi32>
    %39 = arith.cmpi slt, %0, %38 : vector<1x256xi32>
    %cst_10 = arith.constant 1.000000e+00 : f32
    %cst_11 = arith.constant 0.000000e+00 : f32
    %40 = vector.broadcast %cst_10 : f32 to vector<1x256xf32>
    %41 = vector.broadcast %cst_11 : f32 to vector<1x256xf32>
    %42 = arith.select %39, %40, %41 : vector<1x256xi1>, vector<1x256xf32>
    %43 = vector.shape_cast %42 : vector<1x256xf32> to vector<1x256xf32>
    %44 = vector.broadcast %43 : vector<1x256xf32> to vector<4x256xf32>
    %c0 = arith.constant 0 : index
    %c0_12 = arith.constant 0 : index
    %45 = vector.load %arg3[%c0, %c0_12] : memref<4x1xf32, #tpu.memory_space<vmem>>, vector<4x1xf32>
    %c0_13 = arith.constant 0 : index
    %c0_14 = arith.constant 0 : index
    %c0_15 = arith.constant 0 : index
    %46 = vector.load %arg1[%c0_13, %c0_14, %c0_15] : memref<1x4x256xf32, #tpu.memory_space<vmem>>, vector<1x4x256xf32>
    %47 = vector.shape_cast %46 : vector<1x4x256xf32> to vector<4x256xf32>
    %cst_16 = arith.constant dense<0.000000e+00> : vector<4xf32>
    %48 = vector.multi_reduction <add>, %47, %cst_16 [1] : vector<4x256xf32> to vector<4xf32>
    %49 = vector.shape_cast %48 : vector<4xf32> to vector<4x1xf32>
    %cst_17 = arith.constant 2.560000e+02 : f32
    %50 = vector.broadcast %cst_17 : f32 to vector<4x1xf32>
    %51 = arith.divf %49, %50 : vector<4x1xf32>
    %52 = vector.broadcast %51 : vector<4x1xf32> to vector<4x256xf32>
    %53 = arith.subf %47, %52 : vector<4x256xf32>
    %54 = vector.broadcast %51 : vector<4x1xf32> to vector<4x256xf32>
    %55 = arith.subf %47, %54 : vector<4x256xf32>
    %56 = arith.mulf %53, %55 : vector<4x256xf32>
    %cst_18 = arith.constant dense<0.000000e+00> : vector<4xf32>
    %57 = vector.multi_reduction <add>, %56, %cst_18 [1] : vector<4x256xf32> to vector<4xf32>
    %58 = vector.shape_cast %57 : vector<4xf32> to vector<4x1xf32>
    %cst_19 = arith.constant 0.00392156886 : f32
    %59 = vector.broadcast %cst_19 : f32 to vector<4x1xf32>
    %60 = arith.mulf %58, %59 : vector<4x1xf32>
    %cst_20 = arith.constant 9.99999974E-5 : f32
    %61 = vector.broadcast %cst_20 : f32 to vector<4x1xf32>
    %62 = arith.addf %60, %61 : vector<4x1xf32>
    %cst_21 = arith.constant 4.000000e+00 : f32
    %63 = vector.broadcast %cst_21 : f32 to vector<4x1xf32>
    %64 = arith.mulf %63, %62 : vector<4x1xf32>
    %cst_22 = arith.constant 1.000000e+00 : f32
    %65 = vector.broadcast %cst_22 : f32 to vector<4x1xf32>
    %66 = arith.divf %65, %64 : vector<4x1xf32>
    %67 = vector.broadcast %66 : vector<4x1xf32> to vector<4x256xf32>
    %68 = arith.mulf %56, %67 : vector<4x256xf32>
    %cst_23 = arith.constant 5.000000e-01 : f32
    %69 = vector.broadcast %cst_23 : f32 to vector<4x256xf32>
    %70 = arith.addf %68, %69 : vector<4x256xf32>
    %71 = arith.negf %70 : vector<4x256xf32>
    %72 = math.exp %71 : vector<4x256xf32>
    %cst_24 = arith.constant 1.000000e+00 : f32
    %73 = vector.broadcast %cst_24 : f32 to vector<4x256xf32>
    %74 = arith.addf %73, %72 : vector<4x256xf32>
    %75 = arith.divf %73, %74 : vector<4x256xf32>
    %76 = arith.mulf %47, %75 : vector<4x256xf32>
    %c1_i32_25 = arith.constant 1 : i32
    %77 = tpu.dynamic_rotate %76 by %c1_i32_25 dim 1 : vector<4x256xf32>, i32 -> vector<4x256xf32>
    %78 = arith.mulf %23, %77 : vector<4x256xf32>
    %79 = arith.addf %76, %78 : vector<4x256xf32>
    %c255_i32 = arith.constant 255 : i32
    %80 = tpu.dynamic_rotate %76 by %c255_i32 dim 1 : vector<4x256xf32>, i32 -> vector<4x256xf32>
    %81 = arith.mulf %30, %80 : vector<4x256xf32>
    %82 = arith.addf %79, %81 : vector<4x256xf32>
    %c16_i32_26 = arith.constant 16 : i32
    %83 = tpu.dynamic_rotate %82 by %c16_i32_26 dim 1 : vector<4x256xf32>, i32 -> vector<4x256xf32>
    %84 = arith.mulf %37, %83 : vector<4x256xf32>
    %85 = arith.addf %82, %84 : vector<4x256xf32>
    %c240_i32_27 = arith.constant 240 : i32
    %86 = tpu.dynamic_rotate %82 by %c240_i32_27 dim 1 : vector<4x256xf32>, i32 -> vector<4x256xf32>
    %87 = arith.mulf %44, %86 : vector<4x256xf32>
    %88 = arith.addf %85, %87 : vector<4x256xf32>
    %cst_28 = arith.constant 0.111111112 : f32
    %89 = vector.broadcast %cst_28 : f32 to vector<4x256xf32>
    %90 = arith.mulf %88, %89 : vector<4x256xf32>
    %91 = arith.subf %76, %90 : vector<4x256xf32>
    %c0_29 = arith.constant 0 : index
    %c0_30 = arith.constant 0 : index
    %c0_31 = arith.constant 0 : index
    %92 = vector.load %arg2[%c0_29, %c0_30, %c0_31] : memref<4x4x1xf32, #tpu.memory_space<vmem>>, vector<1x4x1xf32>
    %93 = vector.shape_cast %92 : vector<1x4x1xf32> to vector<4x1xf32>
    %94 = vector.extract_strided_slice %91 {offsets = [0, 0], sizes = [1, 256], strides = [1, 1]} : vector<4x256xf32> to vector<1x256xf32>
    %95 = vector.broadcast %93 : vector<4x1xf32> to vector<4x256xf32>
    %96 = vector.broadcast %94 : vector<1x256xf32> to vector<4x256xf32>
    %97 = arith.mulf %95, %96 : vector<4x256xf32>
    %c1 = arith.constant 1 : index
    %c0_32 = arith.constant 0 : index
    %c0_33 = arith.constant 0 : index
    %98 = vector.load %arg2[%c1, %c0_32, %c0_33] : memref<4x4x1xf32, #tpu.memory_space<vmem>>, vector<1x4x1xf32>
    %99 = vector.shape_cast %98 : vector<1x4x1xf32> to vector<4x1xf32>
    %100 = vector.extract_strided_slice %91 {offsets = [1, 0], sizes = [1, 256], strides = [1, 1]} : vector<4x256xf32> to vector<1x256xf32>
    %101 = vector.broadcast %99 : vector<4x1xf32> to vector<4x256xf32>
    %102 = vector.broadcast %100 : vector<1x256xf32> to vector<4x256xf32>
    %103 = arith.mulf %101, %102 : vector<4x256xf32>
    %104 = arith.addf %97, %103 : vector<4x256xf32>
    %c2 = arith.constant 2 : index
    %c0_34 = arith.constant 0 : index
    %c0_35 = arith.constant 0 : index
    %105 = vector.load %arg2[%c2, %c0_34, %c0_35] : memref<4x4x1xf32, #tpu.memory_space<vmem>>, vector<1x4x1xf32>
    %106 = vector.shape_cast %105 : vector<1x4x1xf32> to vector<4x1xf32>
    %107 = vector.extract_strided_slice %91 {offsets = [2, 0], sizes = [1, 256], strides = [1, 1]} : vector<4x256xf32> to vector<1x256xf32>
    %108 = vector.broadcast %106 : vector<4x1xf32> to vector<4x256xf32>
    %109 = vector.broadcast %107 : vector<1x256xf32> to vector<4x256xf32>
    %110 = arith.mulf %108, %109 : vector<4x256xf32>
    %111 = arith.addf %104, %110 : vector<4x256xf32>
    %c3 = arith.constant 3 : index
    %c0_36 = arith.constant 0 : index
    %c0_37 = arith.constant 0 : index
    %112 = vector.load %arg2[%c3, %c0_36, %c0_37] : memref<4x4x1xf32, #tpu.memory_space<vmem>>, vector<1x4x1xf32>
    %113 = vector.shape_cast %112 : vector<1x4x1xf32> to vector<4x1xf32>
    %114 = vector.extract_strided_slice %91 {offsets = [3, 0], sizes = [1, 256], strides = [1, 1]} : vector<4x256xf32> to vector<1x256xf32>
    %115 = vector.broadcast %113 : vector<4x1xf32> to vector<4x256xf32>
    %116 = vector.broadcast %114 : vector<1x256xf32> to vector<4x256xf32>
    %117 = arith.mulf %115, %116 : vector<4x256xf32>
    %118 = arith.addf %111, %117 : vector<4x256xf32>
    %119 = vector.broadcast %45 : vector<4x1xf32> to vector<4x256xf32>
    %120 = arith.addf %118, %119 : vector<4x256xf32>
    %121 = arith.negf %120 : vector<4x256xf32>
    %122 = math.exp %121 : vector<4x256xf32>
    %cst_38 = arith.constant 1.000000e+00 : f32
    %123 = vector.broadcast %cst_38 : f32 to vector<4x256xf32>
    %124 = arith.addf %123, %122 : vector<4x256xf32>
    %125 = arith.divf %123, %124 : vector<4x256xf32>
    %126 = arith.mulf %125, %76 : vector<4x256xf32>
    %127 = arith.addf %126, %76 : vector<4x256xf32>
    %cst_39 = arith.constant dense<0.000000e+00> : vector<4xf32>
    %128 = vector.multi_reduction <add>, %127, %cst_39 [1] : vector<4x256xf32> to vector<4xf32>
    %129 = vector.shape_cast %128 : vector<4xf32> to vector<4x1xf32>
    %cst_40 = arith.constant 2.560000e+02 : f32
    %130 = vector.broadcast %cst_40 : f32 to vector<4x1xf32>
    %131 = arith.divf %129, %130 : vector<4x1xf32>
    %132 = vector.broadcast %131 : vector<4x1xf32> to vector<4x256xf32>
    %133 = arith.subf %127, %132 : vector<4x256xf32>
    %134 = vector.broadcast %131 : vector<4x1xf32> to vector<4x256xf32>
    %135 = arith.subf %127, %134 : vector<4x256xf32>
    %136 = arith.mulf %133, %135 : vector<4x256xf32>
    %cst_41 = arith.constant dense<0.000000e+00> : vector<4xf32>
    %137 = vector.multi_reduction <add>, %136, %cst_41 [1] : vector<4x256xf32> to vector<4xf32>
    %138 = vector.shape_cast %137 : vector<4xf32> to vector<4x1xf32>
    %cst_42 = arith.constant 0.00392156886 : f32
    %139 = vector.broadcast %cst_42 : f32 to vector<4x1xf32>
    %140 = arith.mulf %138, %139 : vector<4x1xf32>
    %cst_43 = arith.constant 9.99999974E-5 : f32
    %141 = vector.broadcast %cst_43 : f32 to vector<4x1xf32>
    %142 = arith.addf %140, %141 : vector<4x1xf32>
    %cst_44 = arith.constant 4.000000e+00 : f32
    %143 = vector.broadcast %cst_44 : f32 to vector<4x1xf32>
    %144 = arith.mulf %143, %142 : vector<4x1xf32>
    %cst_45 = arith.constant 1.000000e+00 : f32
    %145 = vector.broadcast %cst_45 : f32 to vector<4x1xf32>
    %146 = arith.divf %145, %144 : vector<4x1xf32>
    %147 = vector.broadcast %146 : vector<4x1xf32> to vector<4x256xf32>
    %148 = arith.mulf %136, %147 : vector<4x256xf32>
    %cst_46 = arith.constant 5.000000e-01 : f32
    %149 = vector.broadcast %cst_46 : f32 to vector<4x256xf32>
    %150 = arith.addf %148, %149 : vector<4x256xf32>
    %151 = arith.negf %150 : vector<4x256xf32>
    %152 = math.exp %151 : vector<4x256xf32>
    %cst_47 = arith.constant 1.000000e+00 : f32
    %153 = vector.broadcast %cst_47 : f32 to vector<4x256xf32>
    %154 = arith.addf %153, %152 : vector<4x256xf32>
    %155 = arith.divf %153, %154 : vector<4x256xf32>
    %156 = arith.mulf %127, %155 : vector<4x256xf32>
    %c0_48 = arith.constant 0 : index
    %c0_49 = arith.constant 0 : index
    %c0_50 = arith.constant 0 : index
    %157 = vector.load %arg4[%c0_48, %c0_49, %c0_50] : memref<1x4x256xf32, #tpu.memory_space<vmem>>, vector<1x4x256xf32>
    %158 = vector.shape_cast %157 : vector<1x4x256xf32> to vector<4x256xf32>
    %159 = vector.shape_cast %156 : vector<4x256xf32> to vector<1x4x256xf32>
    tpu.vector_store %arg4[%c0_48, %c0_49, %c0_50], %159 {strides = array<i32>} : memref<1x4x256xf32, #tpu.memory_space<vmem>>, vector<1x4x256xf32>,
    return
  }
  func.func @transform_0(%arg0: i32) -> (i32, i32, i32) {
    %c0_i32 = arith.constant 0 : i32
    %c0_i32_0 = arith.constant 0 : i32
    %c0_i32_1 = arith.constant 0 : i32
    return %arg0, %c0_i32, %c0_i32_0 : i32, i32, i32
  }
  func.func @transform_1(%arg0: i32) -> (i32, i32, i32) {
    %c0_i32 = arith.constant 0 : i32
    %c0_i32_0 = arith.constant 0 : i32
    %c0_i32_1 = arith.constant 0 : i32
    %c0_i32_2 = arith.constant 0 : i32
    return %c0_i32, %c0_i32_0, %c0_i32_1 : i32, i32, i32
  }
  func.func @transform_2(%arg0: i32) -> (i32, i32) {
    %c0_i32 = arith.constant 0 : i32
    %c0_i32_0 = arith.constant 0 : i32
    %c0_i32_1 = arith.constant 0 : i32
    return %c0_i32, %c0_i32_0 : i32, i32
  }
  func.func @transform_3(%arg0: i32) -> (i32, i32, i32) {
    %c0_i32 = arith.constant 0 : i32
    %c0_i32_0 = arith.constant 0 : i32
    %c0_i32_1 = arith.constant 0 : i32
    return %arg0, %c0_i32, %c0_i32_0 : i32, i32, i32
  }
}

</mosaic_0001>

<bundles_post_ra>
// kernel: tpu_custom_call.1
= control target key start
LH: loop header
LB: loop body
LE: loop exit
PB: predicated region body
PF: predicated region fallthrough
CT: control target
= control target key end

     0   :  { %8 = vsyncpa [#allocation3], 0  ;;  %s1027_s0 = inlined_call_operand.vmem [shape: f32[2,4,256], index: 0, kind: input, shape index: {}]   ;;  %s1028_s1 = inlined_call_operand.vmem [shape: f32[4,4,1], index: 1, kind: input, shape index: {}]   ;;  %s1029_s2 = inlined_call_operand.vmem [shape: f32[4,1], index: 2, kind: input, shape index: {}]   ;;  %s1030_s3 = inlined_call_operand.hbm [shape: f32[2,4,256], index: 3, kind: output, shape index: {}]  }
   0x1   :  { %10 = vsyncpa [#allocation3 + $0x1], 0  ;;  %s857_s12 = smov 0   ;;  %s859_s13 = smov 0  }
   0x2   :  { %s861_s14 = smov 0   ;;  %s863_s15 = smov 0  }
   0x3 LB: > { %s878_s16 = sadd.s32 4294967295, %s827_s15   ;;  %s667_s17 = sadd.s32 4294967294, %s827_s15   ;;  %s827_s15 = sphi %s863_s15, %s1036_s15   ;;  %s823_s14 = sphi %s861_s14, %s1035_s14   ;;  %s819_s13 = sphi %s859_s13, %s1034_s13   ;;  %s815_s12 = sphi %s857_s12, %s1033_s12  }
   0x4   : > { %s882_s18 = sadd.s32 1, %s827_s15   ;;  %s91_s19 = sadd.s32 1, %s823_s14 }
   0x5   : > { %s88_s20 = ssub.s32 %s827_s15, %s882_s18  ;;  %p101_p0 = scmp.ne.s32.totalorder %s823_s14, %s819_s13 }
   0x6   : > { %p89_p1 = scmp.eq.s32.totalorder %s88_s20, 0  ;;  %p102_p2 = scmp.eq.s32.totalorder %s878_s16, 1 }
   0x7   : > { %p107_p3 = scmp.ne.s32.totalorder %s819_s13, %s815_s12  ;;  %p108_p4 = scmp.eq.s32.totalorder %s667_s17, 1 }
   0x8   : > { %s893_s21 = scalar_select %p89_p1, %s823_s14, %s91_s19  }
   0x9   : > { %p895_p5 = por %p102_p2, %p101_p0  ;;  %p899_p6 = por %p108_p4, %p107_p3 }
   0xa   : > { %p670_p7 = scmp.ge.s32.totalorder %s827_s15, 1  ;;  %p140_p8 = scmp.lt.s32.totalorder %s827_s15, 3 }
   0xc   : > { %p141_p9 = pnand %p670_p7, %p140_p8 }
   0xd   : > { %p164_p10 = scmp.lt.s32.totalorder (!%p141_p9), %s878_s16, 1  ;;  %s831_s29 = smov (!%p141_p9), 1  }
   0xe   : > { %144 = sbr.rel (%p141_p9) target bundleno = 984 (0x3d8), region = 32  ;;  %s832_s30 = smov (!%p141_p9), 127  }
   0xf   : > { %s835_s4 = smov (!%p141_p9), 16   ;;  %s836_s7 = smov (!%p141_p9), 112  }
  0x10   : > { %s688_s27 = sshll.u32 (!%p141_p9), %s878_s16, 3  ;;  %s785_s11 = scalar_lea.hbm (!%p141_p9), %s1030_s3, 16 }
  0x13   : > { %s165_s24 = scalar_select %p164_p10, %s878_s16, 1  ;;  %vm220_vm0 = vcmask 1043456   ;;  %v829_v6 = vmov 256.0   ;;  %v830_v12 = vmov 839922192   ;;  %v169_v61 = vlaneseq }
  0x14   : > { %739 = vrcp.f32 %v829_v6  ;;  %v236_v13 = vunpack.c.l.s4 %v830_v12  ;;  %v834_v6 = vmov 0.0  }
  0x15   : > { %s687_s25 = sshll.u32 %s165_s24, 3  ;;  %v926_v62 = vand.u32 127, %v169_v61 }
  0x16   : > { %s168_s28 = scalar_lea.vmem %s1027_s0, %s687_s25  ;;  %v237_v15 = vunpack.c.0.s8 %v236_v13  ;;  %s161_s25 = sand.u32 1, %s819_s13  }
  0x17   : > { %v910_v0 = vld [vmem:[%s168_s28] sm:$0xff]  ;;  %vm329_vm11 = vcmp.lt.s32.totalorder %v926_v62, 127  ;;  %vm309_vm14 = vcmp.lt.s32.totalorder %v926_v62, 1  ;;  %s988_s26 = sshll.u32 %s161_s25, 3  ;;  %s592_s6 = scalar_lea.sflag [#allocation3], %s161_s25 }
  0x18   : > { %215 = vst [vmem:[#allocation1] ss:$2 sm:$0xff] %v910_v0  ;;  %s163_s16 = scalar_lea.vmem [#allocation2], %s988_s26 }
  0x1a   : > { %v740_v7 = vpop.eup %739 }
  0x1b   : > { %v227_v8 = vmul.f32 256.0, %v740_v7  ;;  %vm231_vm1 = vweird.f32 %v740_v7 }
  0x1d   : > { %v228_v9 = vsub.f32 1.0, %v227_v8 }
  0x1f   : > { %v216_v1 = vld.sshfl [vmem:[#allocation1] sm:$0xff pattern:$0x75316420]  ;;  %v217_v2 = vld.sshfl [vmem:[#allocation1 + $0x8] sm:$0xff pattern:$0x75316420]  ;;  %v229_v10 = vmul.f32 %v740_v7, %v228_v9 }
  0x20   : > { %v221_v3 = vsel %vm220_vm0, %v216_v1, 0.0  ;;  %v222_v4 = vsel %vm220_vm0, %v217_v2, 0.0 }
  0x21   : > { %v223_v5 = vadd.f32 %v222_v4, %v221_v3  ;;  %v230_v11 = vadd.f32 %v740_v7, %v229_v10  ;;  %v176_v4 = vand.u32 15, %v926_v62 }
  0x23   : > { %224 = vadd.xlane.f32.xlu0 %v223_v5  ;;  %v915_v14 = vsel %vm231_vm1, %v740_v7, %v230_v11  ;;  %v833_v5 = vmov 0   ;;  %vm196_vm13 = vcmp.gt.s32.totalorder %v176_v4, 0  ;;  %vm200_vm15 = vcmp.lt.s32.totalorder %v176_v4, 15 }
  0x24   : > { %737 = vset.pattern.permute.xlu1 %v833_v5  ;;  %738 = vset.pattern.permute.xlu0 %v833_v5  ;;  %v198_v12 = vsel %vm196_vm13, 1.0, %v834_v6  ;;  %vm204_vm1 = vcmp.ge.s32.totalorder %v926_v62, 16 }
  0x25   : > { %736 = vset.pattern.permute.xlu2 %v833_v5 }
  0x96   : > { %v225_v16 = vpop.xlane.xlu0 %224 }
  0x97   : > { %v233_v17 = vmul.f32 %v915_v14, %v225_v16 }
  0x99   : > { %v238_v18 = vperm.slane %v233_v17, %v237_v15  ;;  %v202_v17 = vsel %vm200_vm15, 1.0, %v834_v6 }
  0x9b   : > { %v240_v19 = vsub.f32 %v910_v0, %v238_v18 }
  0x9d   : > { %v241_v20 = vmul.f32 %v240_v19, %v240_v19 }
  0x9f   : > { %243 = vst [vmem:[#allocation1] ss:$2 sm:$0xff] %v241_v20 }
  0xa6   : > { %v244_v21 = vld.sshfl [vmem:[#allocation1] sm:$0xff pattern:$0x75316420]  ;;  %v245_v22 = vld.sshfl [vmem:[#allocation1 + $0x8] sm:$0xff pattern:$0x75316420] }
  0xa7   : > { %v248_v23 = vsel %vm220_vm0, %v244_v21, 0.0  ;;  %v249_v24 = vsel %vm220_vm0, %v245_v22, 0.0 }
  0xa8   : > { %v250_v25 = vadd.f32 %v249_v24, %v248_v23 }
  0xaa   : > { %251 = vadd.xlane.f32.xlu0 %v250_v25 }
 0x11d   : > { %v252_v26 = vpop.xlane.xlu0 %251 }
 0x11e   : > { %v253_v27 = vmul.f32 0.003921569, %v252_v26 }
 0x120   : > { %v254_v28 = vadd.f32 0.0001, %v253_v27 }
 0x122   : > { %v255_v29 = vmul.f32 4.0, %v254_v28 }
 0x124   : > { %741 = vrcp.f32 %v255_v29  ;;  %v267_v33 = vand.u32 2147483648, %v255_v29  ;;  %v265_v35 = vand.u32 2147483647, %v255_v29  ;;  %vm261_vm3 = vweird.f32 %v255_v29 }
 0x126   : > { %v268_v37 = vor.u32 1.1754944e-38, %v267_v33  ;;  %vm266_vm5 = vcmp.eq.f32.partialorder %v265_v35, 8.507059e+37  ;;  %v383_v33 = vld [vmem:[%s1028_s1] sm:$0xf] }
 0x12a   : > { %v742_v30 = vpop.eup %741 }
 0x12b   : > { %v257_v31 = vmul.f32 %v742_v30, %v255_v29  ;;  %vm262_vm2 = vweird.f32 %v742_v30  ;;  %v677_v29 = vld [vmem:[%s1028_s1 + $0xc] sm:$0xf] }
 0x12c   : > { %vm263_vm4 = vmor %vm261_vm3, %vm262_vm2  ;;  %vm350_vm2 = vcmp.lt.s32.totalorder %v926_v62, 16 }
 0x12d   : > { %v258_v32 = vsub.f32 1.0, %v257_v31 }
 0x12f   : > { %v259_v34 = vmul.f32 %v742_v30, %v258_v32  ;;  %v675_v32 = vld [vmem:[%s1028_s1 + $0x4] sm:$0xf] }
 0x131   : > { %v260_v36 = vadd.f32 %v742_v30, %v259_v34 }
 0x133   : > { %v264_v38 = vsel %vm263_vm4, %v742_v30, %v260_v36  ;;  %v212_v36 = vld [vmem:[%s1029_s2] sm:$0xf]  ;;  %vm370_vm4 = vcmp.lt.s32.totalorder %v926_v62, 112 }
 0x134   : > { %v269_v39 = vsel %vm266_vm5, %v268_v37, %v264_v38  ;;  %v676_v37 = vld [vmem:[%s1028_s1 + $0x8] sm:$0xf] }
 0x135   : > { %v275_v40 = vperm.slane %v269_v39, %v237_v15 }
 0x137   : > { %v277_v41 = vmul.f32 %v275_v40, %v241_v20  ;;  %v206_v40 = vsel %vm204_vm1, 1.0, %v834_v6 }
 0x139   : > { %v278_v42 = vadd.f32 0.5, %v277_v41 }
 0x13b   : > { %v674_v43 = vmul.f32 -1.442695, %v278_v42 }
 0x13d   : > { %743 = vpow2.f32 %v674_v43 }
 0x143   : > { %v744_v44 = vpop.eup %743 }
 0x144   : > { %v282_v45 = vadd.f32 1.0, %v744_v44 }
 0x146   : > { %745 = vrcp.f32 %v282_v45  ;;  %v294_v49 = vand.u32 2147483648, %v282_v45  ;;  %v292_v51 = vand.u32 2147483647, %v282_v45  ;;  %vm288_vm7 = vweird.f32 %v282_v45 }
 0x148   : > { %v295_v53 = vor.u32 1.1754944e-38, %v294_v49  ;;  %vm293_vm9 = vcmp.eq.f32.partialorder %v292_v51, 8.507059e+37 }
 0x14c   : > { %v746_v46 = vpop.eup %745 }
 0x14d   : > { %v284_v47 = vmul.f32 %v746_v46, %v282_v45  ;;  %vm289_vm6 = vweird.f32 %v746_v46 }
 0x14e   : > { %vm290_vm8 = vmor %vm288_vm7, %vm289_vm6 }
 0x14f   : > { %v285_v48 = vsub.f32 1.0, %v284_v47 }
 0x151   : > { %v286_v50 = vmul.f32 %v746_v46, %v285_v48 }
 0x153   : > { %v287_v52 = vadd.f32 %v746_v46, %v286_v50 }
 0x155   : > { %v291_v54 = vsel %vm290_vm8, %v746_v46, %v287_v52 }
 0x156   : > { %v296_v55 = vsel %vm293_vm9, %v295_v53, %v291_v54 }
 0x157   : > { %v922_v56 = vmul.f32 %v296_v55, %v910_v0  ;;  %v929_v0 = vadd.s32 128, %v926_v62 }
 0x159   : > { %300 = vst [vmem:[#allocation1] ss:$2 sm:$0xff] %v922_v56  ;;  %v183_v1 = vand.u32 15, %v929_v0  ;;  %vm209_vm3 = vcmp.lt.s32.totalorder %v929_v0, 240 }
 0x15a   : > { %v211_v45 = vsel %vm209_vm3, 1.0, %v834_v6 }
 0x15b   : > { %vm201_vm10 = vcmp.lt.s32.totalorder %v183_v1, 15  ;;  %vm197_vm12 = vcmp.gt.s32.totalorder %v183_v1, 0 }
 0x15c   : > { %v203_v7 = vsel %vm201_vm10, 1.0, %v834_v6  ;;  %v199_v9 = vsel %vm197_vm12, 1.0, %v834_v6 }
 0x160   : > { %v301_v57 = vld.sshfl [vmem:[#allocation1] sm:$0xff pattern:$0x75316420]  ;;  %v302_v58 = vld.sshfl [vmem:[#allocation1 + $0x8] sm:$0xff pattern:$0x75316420] }
 0x161   : > { %305 = vrot.lane.b32.xlu1 %v301_v57, %s831_s29  ;;  %320 = vst [vmem:[#allocation1] ss:$2 sm:$0xff] %v922_v56 }
 0x168   : > { %v321_v59 = vld.sshfl [vmem:[#allocation1] sm:$0xff pattern:$0x75316420]  ;;  %v322_v60 = vld.sshfl [vmem:[#allocation1 + $0x8] sm:$0xff pattern:$0x75316420] }
 0x169   : > { %307 = vrot.lane.b32.xlu1 %v302_v58, %s831_s29  ;;  %325 = vrot.lane.b32.xlu2 %v321_v59, %s832_s30 }
 0x171   : > { %327 = vrot.lane.b32.xlu2 %v322_v60, %s832_s30  ;;  %s603_s30 = scalar_lea.hbm %s1030_s3, %s688_s27 }
 0x172   : > { %s607_s5 = sshll.u32 %s603_s30, 4  ;;  %s608_s5 = int_to_ptr.hbm [resolvable:$true] %s607_s5 }
 0x1c3   : > { %v326_v63 = vpop.permute.xlu2 %325 }
 0x1cb   : > { %v328_v3 = vpop.permute.xlu2 %327 }
 0x1cc   : > { %v331_v8 = vsel %vm329_vm11, %v328_v3, %v326_v63  ;;  %v330_v18 = vsel %vm329_vm11, %v326_v63, %v328_v3 }
 0x1cd   : > { %v333_v10 = vmul.f32 %v331_v8, %v203_v7  ;;  %v332_v22 = vmul.f32 %v330_v18, %v202_v17 }
 0x1cf   : > { %v336_v19 = vrot.slane %v333_v10, 4 }
 0x1d1   : > { %v337_v25 = vsel %vm220_vm0, %v332_v22, %v336_v19 }
 0x1d3   : > { %v306_v2 = vpop.permute.xlu1 %305 }
 0x1db   : > { %v308_v11 = vpop.permute.xlu1 %307 }
 0x1dc   : > { %v310_v13 = vsel %vm309_vm14, %v306_v2, %v308_v11  ;;  %v311_v15 = vsel %vm309_vm14, %v308_v11, %v306_v2 }
 0x1dd   : > { %v313_v16 = vmul.f32 %v310_v13, %v199_v9  ;;  %v312_v20 = vmul.f32 %v311_v15, %v198_v12 }
 0x1df   : > { %v316_v21 = vrot.slane %v313_v16, 4 }
 0x1e1   : > { %v317_v23 = vsel %vm220_vm0, %v312_v20, %v316_v21 }
 0x1e2   : > { %v319_v24 = vadd.f32 %v317_v23, %v922_v56 }
 0x1e4   : > { %v339_v26 = vadd.f32 %v337_v25, %v319_v24 }
 0x1e6   : > { %341 = vst [vmem:[#allocation1] ss:$2 sm:$0xff] %v339_v26 }
 0x1ed   : > { %v343_v27 = vld.sshfl [vmem:[#allocation1 + $0x8] sm:$0xff pattern:$0x75316420]  ;;  %v342_v28 = vld.sshfl [vmem:[#allocation1] sm:$0xff pattern:$0x75316420] }
 0x1ee   : > { %348 = vrot.lane.b32.xlu1 %v343_v27, %s835_s4  ;;  %346 = vrot.lane.b32.xlu0 %v342_v28, %s835_s4  ;;  %361 = vst [vmem:[#allocation1] ss:$2 sm:$0xff] %v339_v26  ;;  %s605_s4 = sshll.u32 %s163_s16, 4  ;;  %s606_s4 = int_to_ptr.vmem [resolvable:$true] %s605_s4 }
 0x1f5   : > { %v363_v30 = vld.sshfl [vmem:[#allocation1 + $0x8] sm:$0xff pattern:$0x75316420]  ;;  %v362_v31 = vld.sshfl [vmem:[#allocation1] sm:$0xff pattern:$0x75316420] }
 0x1f6   : > { %368 = vrot.lane.b32.xlu1 %v363_v30, %s836_s7  ;;  %366 = vrot.lane.b32.xlu2 %v362_v31, %s836_s7  ;;  %494 = vst [vmem:[#allocation1] ss:$2 sm:$0xff] %v922_v56  ;;  %s779_s7 = sshra.s32 %s608_s5, 4  ;;  %s780_s7 = int_to_ptr.hbm [resolvable:$true] %s779_s7 }
 0x1f7   : > { %436 = vperm.xlu0 %738, %v677_v29   ;;  %s781_s8 = scalar_lea.hbm %s780_s7, 8  ;;  %p786_p0 = scmp.lt.s32.totalorder %s780_s7, %s1030_s3 }
 0x1f8   : > { %p782_p11 = scmp.ne.s32.totalorder %s780_s7, %s781_s8  ;;  %p787_p1 = scmp.lt.s32.totalorder %s785_s11, %s781_s8 }
 0x1fa   : > { %p783_p12 = pnand %p782_p11, %p895_p5  ;;  %p788_p2 = por %p787_p1, %p786_p0 }
 0x1fc   : > { %p784_p13 = pneg %p783_p12 }
 0x1fd   : > { %v952_v34 = vld.sshfl [vmem:[#allocation1] sm:$0xff pattern:$0x75316420]  ;;  %v954_v35 = vld.sshfl [vmem:[#allocation1 + $0x8] sm:$0xff pattern:$0x75316420] }
 0x1fe   : > { %402 = vperm.xlu1 %737, %v675_v32   ;;  %386 = vperm.xlu2 %736, %v383_v33   ;;  %501 = vst [vmem:[#allocation1] ss:$2 sm:$0xff] %v922_v56  ;;  %p789_p3 = pnand %p788_p2, %p784_p13 }
 0x206   : > { %451 = vperm.xlu1 %737, %v212_v36   ;;  %419 = vperm.xlu2 %736, %v676_v37  }
 0x250   : > { %v367_v46 = vpop.permute.xlu2 %366 }
 0x258   : > { %v387_v57 = vpop.permute.xlu2 %386 }
 0x260   : > { %v349_v38 = vpop.permute.xlu1 %348  ;;  %v347_v39 = vpop.permute.xlu0 %346 }
 0x261   : > { %v351_v41 = vsel %vm350_vm2, %v347_v39, %v349_v38  ;;  %v352_v42 = vsel %vm350_vm2, %v349_v38, %v347_v39  ;;  %v420_v17 = vpop.permute.xlu2 %419 }
 0x262   : > { %v353_v43 = vmul.f32 %v352_v42, %v206_v40  ;;  %v357_v44 = vrot.slane %v351_v41, 4 }
 0x264   : > { %v358_v49 = vsel %vm220_vm0, %v353_v43, %v357_v44 }
 0x265   : > { %v360_v52 = vadd.f32 %v358_v49, %v339_v26 }
 0x268   : > { %v369_v47 = vpop.permute.xlu1 %368 }
 0x269   : > { %v372_v48 = vsel %vm370_vm4, %v369_v47, %v367_v46  ;;  %v371_v53 = vsel %vm370_vm4, %v367_v46, %v369_v47  ;;  %v437_v18 = vpop.permute.xlu0 %436 }
 0x26a   : > { %v374_v50 = vmul.f32 %v372_v48, %v211_v45 }
 0x26c   : > { %v377_v51 = vrot.slane %v374_v50, 4 }
 0x26e   : > { %v378_v54 = vsel %vm220_vm0, %v371_v53, %v377_v51 }
 0x26f   : > { %v380_v55 = vadd.f32 %v378_v54, %v360_v52 }
 0x270   : > { %v403_v0 = vpop.permute.xlu1 %402 }
 0x271   : > { %v381_v58 = vmul.f32 0.11111111, %v380_v55 }
 0x273   : > { %v382_v59 = vsub.f32 %v922_v56, %v381_v58 }
 0x275   : > { %v390_v60 = vperm.slane %v382_v59, 0  ;;  %v391_v61 = vperm.slane %v382_v59, 4  ;;  %v405_v62 = vperm.slane %v382_v59, 1  ;;  %v406_v63 = vperm.slane %v382_v59, 5 }
 0x276   : > { %v422_v1 = vperm.slane %v382_v59, 2  ;;  %v423_v2 = vperm.slane %v382_v59, 6  ;;  %v439_v3 = vperm.slane %v382_v59, 3  ;;  %v440_v4 = vperm.slane %v382_v59, 7 }
 0x277   : > { %v394_v5 = vperm.slane %v390_v60, 0  ;;  %v395_v6 = vperm.slane %v391_v61, 0  ;;  %v409_v7 = vperm.slane %v405_v62, 1  ;;  %v410_v8 = vperm.slane %v406_v63, 1 }
 0x278   : > { %v426_v9 = vperm.slane %v422_v1, 2  ;;  %v427_v10 = vperm.slane %v423_v2, 2  ;;  %v443_v11 = vperm.slane %v439_v3, 3  ;;  %v444_v12 = vperm.slane %v440_v4, 3  ;;  %v452_v29 = vpop.permute.xlu1 %451 }
 0x279   : > { %v396_v13 = vmul.f32 %v394_v5, %v387_v57  ;;  %v397_v15 = vmul.f32 %v395_v6, %v387_v57  ;;  %v411_v56 = vmul.f32 %v409_v7, %v403_v0  ;;  %v412_v16 = vmul.f32 %v410_v8, %v403_v0  ;;  %v502_v63 = vld.sshfl [vmem:[#allocation1] sm:$0xff pattern:$0x75316420]  ;;  %v503_v0 = vld.sshfl [vmem:[#allocation1 + $0x8] sm:$0xff pattern:$0x75316420] }
 0x27a   : > { %v428_v21 = vmul.f32 %v426_v9, %v420_v17  ;;  %v429_v22 = vmul.f32 %v427_v10, %v420_v17  ;;  %v445_v25 = vmul.f32 %v443_v11, %v437_v18  ;;  %v446_v26 = vmul.f32 %v444_v12, %v437_v18 }
 0x27b   : > { %v413_v19 = vadd.f32 %v411_v56, %v396_v13  ;;  %v414_v20 = vadd.f32 %v412_v16, %v397_v15 }
 0x27d   : > { %v430_v23 = vadd.f32 %v428_v21, %v413_v19  ;;  %v431_v24 = vadd.f32 %v429_v22, %v414_v20 }
 0x27f   : > { %v447_v27 = vadd.f32 %v445_v25, %v430_v23  ;;  %v448_v28 = vadd.f32 %v446_v26, %v431_v24 }
 0x281   : > { %v454_v30 = vadd.f32 %v452_v29, %v447_v27  ;;  %v455_v31 = vadd.f32 %v452_v29, %v448_v28 }
 0x283   : > { %v678_v32 = vmul.f32 -1.442695, %v454_v30  ;;  %v679_v33 = vmul.f32 -1.442695, %v455_v31 }
 0x285   : > { %747 = vpow2.f32 %v678_v32 }
 0x286   : > { %749 = vpow2.f32 %v679_v33 }
 0x28b   : > { %v748_v36 = vpop.eup %747 }
 0x28c   : > { %v750_v37 = vpop.eup %749  ;;  %v462_v38 = vadd.f32 1.0, %v748_v36 }
 0x28d   : > { %v463_v39 = vadd.f32 1.0, %v750_v37 }
 0x28e   : > { %751 = vrcp.f32 %v462_v38  ;;  %v475_v46 = vand.u32 2147483648, %v462_v38  ;;  %v473_v48 = vand.u32 2147483647, %v462_v38  ;;  %vm469_vm7 = vweird.f32 %v462_v38 }
 0x28f   : > { %753 = vrcp.f32 %v463_v39  ;;  %v490_v49 = vand.u32 2147483648, %v463_v39  ;;  %v488_v51 = vand.u32 2147483647, %v463_v39  ;;  %vm484_vm9 = vweird.f32 %v463_v39 }
 0x290   : > { %v476_v53 = vor.u32 1.1754944e-38, %v475_v46  ;;  %vm474_vm10 = vcmp.eq.f32.partialorder %v473_v48, 8.507059e+37 }
 0x291   : > { %v491_v57 = vor.u32 1.1754944e-38, %v490_v49  ;;  %vm489_vm12 = vcmp.eq.f32.partialorder %v488_v51, 8.507059e+37 }
 0x294   : > { %v752_v40 = vpop.eup %751 }
 0x295   : > { %v754_v41 = vpop.eup %753  ;;  %v465_v42 = vmul.f32 %v752_v40, %v462_v38  ;;  %vm470_vm5 = vweird.f32 %v752_v40 }
 0x296   : > { %v480_v43 = vmul.f32 %v754_v41, %v463_v39  ;;  %vm485_vm6 = vweird.f32 %v754_v41  ;;  %vm471_vm8 = vmor %vm469_vm7, %vm470_vm5 }
 0x297   : > { %v466_v44 = vsub.f32 1.0, %v465_v42  ;;  %vm486_vm11 = vmor %vm484_vm9, %vm485_vm6 }
 0x298   : > { %v481_v45 = vsub.f32 1.0, %v480_v43 }
 0x299   : > { %v467_v47 = vmul.f32 %v752_v40, %v466_v44 }
 0x29a   : > { %v482_v50 = vmul.f32 %v754_v41, %v481_v45 }
 0x29b   : > { %v468_v52 = vadd.f32 %v752_v40, %v467_v47 }
 0x29c   : > { %v483_v54 = vadd.f32 %v754_v41, %v482_v50 }
 0x29d   : > { %v472_v55 = vsel %vm471_vm8, %v752_v40, %v468_v52 }
 0x29e   : > { %v477_v58 = vsel %vm474_vm10, %v476_v53, %v472_v55  ;;  %v487_v59 = vsel %vm486_vm11, %v754_v41, %v483_v54 }
 0x29f   : > { %v492_v60 = vsel %vm489_vm12, %v491_v57, %v487_v59  ;;  %v499_v61 = vmul.f32 %v952_v34, %v477_v58 }
 0x2a0   : > { %v500_v62 = vmul.f32 %v954_v35, %v492_v60 }
 0x2a1   : > { %v972_v1 = vadd.f32 %v502_v63, %v499_v61 }
 0x2a2   : > { %v974_v2 = vadd.f32 %v503_v0, %v500_v62 }
 0x2a3   : > { %v508_v3 = vsel %vm220_vm0, %v972_v1, 0.0 }
 0x2a4   : > { %v509_v4 = vsel %vm220_vm0, %v974_v2, 0.0 }
 0x2a5   : > { %v510_v5 = vadd.f32 %v509_v4, %v508_v3 }
 0x2a7   : > { %511 = vadd.xlane.f32.xlu2 %v510_v5 }
 0x31a   : > { %v512_v6 = vpop.xlane.xlu2 %511 }
 0x31b   : > { %v513_v7 = vmul.f32 %v512_v6, %v915_v14 }
 0x31d   : > { %v514_v34 = vsub.f32 %v972_v1, %v513_v7  ;;  %v515_v35 = vsub.f32 %v974_v2, %v513_v7 }
 0x31f   : > { %v516_v8 = vmul.f32 %v514_v34, %v514_v34  ;;  %v517_v9 = vmul.f32 %v515_v35, %v515_v35 }
 0x321   : > { %v518_v10 = vsel %vm220_vm0, %v516_v8, 0.0  ;;  %v519_v11 = vsel %vm220_vm0, %v517_v9, 0.0 }
 0x322   : > { %v520_v12 = vadd.f32 %v519_v11, %v518_v10 }
 0x324   : > { %521 = vadd.xlane.f32.xlu1 %v520_v12 }
 0x397   : > { %v522_v13 = vpop.xlane.xlu1 %521 }
 0x398   : > { %v523_v15 = vmul.f32 0.003921569, %v522_v13 }
 0x39a   : > { %v524_v56 = vadd.f32 0.0001, %v523_v15 }
 0x39c   : > { %v525_v16 = vmul.f32 4.0, %v524_v56 }
 0x39e   : > { %755 = vrcp.f32 %v525_v16  ;;  %v537_v19 = vand.u32 2147483648, %v525_v16  ;;  %v535_v21 = vand.u32 2147483647, %v525_v16  ;;  %vm531_vm14 = vweird.f32 %v525_v16 }
 0x3a0   : > { %v538_v23 = vor.u32 1.1754944e-38, %v537_v19  ;;  %vm536_vm1 = vcmp.eq.f32.partialorder %v535_v21, 8.507059e+37 }
 0x3a4   : > { %v756_v17 = vpop.eup %755 }
 0x3a5   : > { %v527_v18 = vmul.f32 %v756_v17, %v525_v16  ;;  %vm532_vm13 = vweird.f32 %v756_v17 }
 0x3a6   : > { %vm533_vm15 = vmor %vm531_vm14, %vm532_vm13 }
 0x3a7   : > { %v528_v14 = vsub.f32 1.0, %v527_v18 }
 0x3a9   : > { %v529_v20 = vmul.f32 %v756_v17, %v528_v14 }
 0x3ab   : > { %v530_v22 = vadd.f32 %v756_v17, %v529_v20 }
 0x3ad   : > { %v534_v24 = vsel %vm533_vm15, %v756_v17, %v530_v22 }
 0x3ae   : > { %v539_v25 = vsel %vm536_vm1, %v538_v23, %v534_v24 }
 0x3af   : > { %v541_v26 = vmul.f32 %v539_v25, %v516_v8  ;;  %v542_v27 = vmul.f32 %v539_v25, %v517_v9 }
 0x3b1   : > { %v543_v28 = vadd.f32 0.5, %v541_v26  ;;  %v544_v29 = vadd.f32 0.5, %v542_v27 }
 0x3b3   : > { %v680_v30 = vmul.f32 -1.442695, %v543_v28  ;;  %v681_v31 = vmul.f32 -1.442695, %v544_v29 }
 0x3b5   : > { %757 = vpow2.f32 %v680_v30 }
 0x3b6   : > { %759 = vpow2.f32 %v681_v31 }
 0x3bb   : > { %v758_v32 = vpop.eup %757 }
 0x3bc   : > { %v760_v33 = vpop.eup %759  ;;  %v551_v36 = vadd.f32 1.0, %v758_v32 }
 0x3bd   : > { %v552_v37 = vadd.f32 1.0, %v760_v33 }
 0x3be   : > { %761 = vrcp.f32 %v551_v36  ;;  %v564_v45 = vand.u32 2147483648, %v551_v36  ;;  %v562_v47 = vand.u32 2147483647, %v551_v36  ;;  %vm558_vm4 = vweird.f32 %v551_v36 }
 0x3bf   : > { %763 = vrcp.f32 %v552_v37  ;;  %v579_v46 = vand.u32 2147483648, %v552_v37  ;;  %v577_v49 = vand.u32 2147483647, %v552_v37  ;;  %vm573_vm6 = vweird.f32 %v552_v37 }
 0x3c0   : > { %v565_v53 = vor.u32 1.1754944e-38, %v564_v45  ;;  %vm563_vm8 = vcmp.eq.f32.partialorder %v562_v47, 8.507059e+37 }
 0x3c1   : > { %v580_v54 = vor.u32 1.1754944e-38, %v579_v46  ;;  %vm578_vm9 = vcmp.eq.f32.partialorder %v577_v49, 8.507059e+37 }
 0x3c4   : > { %v762_v38 = vpop.eup %761 }
 0x3c5   : > { %v764_v39 = vpop.eup %763  ;;  %v554_v40 = vmul.f32 %v762_v38, %v551_v36  ;;  %vm559_vm2 = vweird.f32 %v762_v38 }
 0x3c6   : > { %v569_v41 = vmul.f32 %v764_v39, %v552_v37  ;;  %vm574_vm3 = vweird.f32 %v764_v39  ;;  %vm560_vm5 = vmor %vm558_vm4, %vm559_vm2 }
 0x3c7   : > { %v555_v42 = vsub.f32 1.0, %v554_v40  ;;  %vm575_vm7 = vmor %vm573_vm6, %vm574_vm3 }
 0x3c8   : > { %v570_v43 = vsub.f32 1.0, %v569_v41 }
 0x3c9   : > { %v556_v44 = vmul.f32 %v762_v38, %v555_v42 }
 0x3ca   : > { %v571_v48 = vmul.f32 %v764_v39, %v570_v43 }
 0x3cb   : > { %v557_v50 = vadd.f32 %v762_v38, %v556_v44 }
 0x3cc   : > { %v572_v51 = vadd.f32 %v764_v39, %v571_v48 }
 0x3cd   : > { %v561_v52 = vsel %vm560_vm5, %v762_v38, %v557_v50 }
 0x3ce   : > { %v576_v55 = vsel %vm575_vm7, %v764_v39, %v572_v51  ;;  %v566_v57 = vsel %vm563_vm8, %v565_v53, %v561_v52 }
 0x3cf   : > { %v581_v58 = vsel %vm578_vm9, %v580_v54, %v576_v55  ;;  %v583_v60 = vmul.f32 %v566_v57, %v972_v1 }
 0x3d0   : > { %v584_v59 = vmul.f32 %v581_v58, %v974_v2 }
 0x3d2   : > { %v587_v61 = vrot.slane %v584_v59, 4 }
 0x3d4   : > { %v588_v62 = vsel %vm220_vm0, %v583_v60, %v587_v61 }
 0x3d5   : > { %590 = vst [vmem:[%s163_s16] sm:$0xff] %v588_v62 }
 0x3d6   : > { %792 = shalt.err (!%p789_p3)
}
 0x3d7   : > { %689 = dma.vmem_to_hbm [thread:$0]  (%p895_p5), %s606_s4, 128, %s608_s5, %s592_s6  }
 0x3d8 PF: > { %p695_p4 = scmp.ge.s32.totalorder %s827_s15, 2  ;;  %s619_s20 = sand.u32 1, %s815_s12  }
 0x3d9   : > { %s620_s24 = scalar_lea.sflag [#allocation3], %s619_s20 }
 0x3da   : > { %p692_p7 = pnand %p695_p4, %p899_p6 }
 0x3dc   : > { %p693_p8 = pneg %p692_p7 }
 0x3de   : > { %810 = dma.done.wait (%p693_p8), %s620_s24, 128  }
 0x3df   : > { %812 = vsyncadd (%p693_p8), %s620_s24, 4294967168  ;;  %p13_p9 = scmp.ge.s32.totalorder %s882_s18, 4   ;;  %s1033_s12 = smov %s819_s13 }
 0x3e0   : > { %s1034_s13 = smov %s823_s14  ;;  %s1035_s14 = smov %s893_s21 }
 0x3e1   : > { %s1036_s15 = smov %s882_s18  ;;  %15 = sbr.rel (!%p13_p9) target bundleno = 3 (0x3), region = 70 }
 0x3e6   :  { %626 = vsyncpa [#allocation3], 1 }
 0x3e7   :  { %628 = vsyncpa [#allocation3 + $0x1], 1 }

</bundles_post_ra>
